<compile_context>
chip_gen: v6e
topology: v6e:2x2x1
jax: 0.10.0
libtpu: 0.0.40
codegen_flags: <defaults>
</compile_context>

<pallas_src>
import functools
import math

import jax
import jax.numpy as jnp
from jax.experimental import pallas as pl
from jax.experimental.pallas import tpu as pltpu

ALPHA = 1.0
GAMMA = 2.0
LANES = 128
MAX_BLOCK_M = 8192                 # 8192*128*4B = 4 MiB per f32 input tile
VMEM_LIMIT_BYTES = 32 * 1024 * 1024


def _num_tensorcores():
    """2 on 2-TensorCore parts (v7x); 1 on v5e/v6e or if detection fails."""
    try:
        kind = jax.devices()[0].device_kind.lower()
    except Exception:
        return 1
    return 2 if "v7" in kind else 1


def _focal_elementwise(x, t, alpha, gamma):
    """Reference focal term, elementwise, in f32 (used for tail + reference)."""
    x = x.astype(jnp.float32)
    t = t.astype(jnp.float32)
    bce = jnp.maximum(x, 0.0) - x * t + jnp.log1p(jnp.exp(-jnp.abs(x)))
    pt = jnp.exp(-bce)
    omp = 1.0 - pt
    mod = omp * omp if gamma == 2.0 else jnp.power(omp, gamma)
    focal = mod * bce
    if alpha != 1.0:
        focal = alpha * focal
    return focal


def _focal_loss_kernel(x_ref, t_ref, o_ref, *, alpha, gamma, hard_targets,
                       rows, block_m, blocks_per_core, total_blocks,
                       grid_blocks):
    c = pl.program_id(0)              # parallel (core) axis
    i = pl.program_id(1)              # arbitrary (reduction) axis
    b = c * blocks_per_core + i       # global block index

    @pl.when(i == 0)
    def _init():
        o_ref[...] = jnp.zeros_like(o_ref)

    x = x_ref[...].astype(jnp.float32)
    t = t_ref[...].astype(jnp.float32)

    # Numerically stable BCE-with-logits (reduction='none').
    s = jnp.exp(-jnp.abs(x))                         # exp(-|x|)
    bce = jnp.maximum(x, 0.0) - x * t + jnp.log1p(s)

    if hard_targets:
        # Valid for t in {0,1}: pt = [s or 1] / (1 + s). Drops the second full
        # EUP exp; approx reciprocal is a single cheap EUP op (~1e-3 accurate).
        num = jnp.where((t > 0.5) == (x < 0.0), s, 1.0)
        pt = num * pl.reciprocal(1.0 + s, approx=True)
    else:
        pt = jnp.exp(-bce)                           # general path (soft targets)

    omp = 1.0 - pt
    if gamma == 2.0:
        mod = omp * omp                              # pure VPU, no pow
    elif gamma == 1.0:
        mod = omp
    else:
        mod = jnp.power(omp, gamma)                  # generic fallback
    focal = mod * bce
    if alpha != 1.0:
        focal = alpha * focal

    def accumulate(vals):
        # Fold row groups into the resident (8,128) vreg accumulator:
        # pure VPU adds, no cross-lane reduction, no masked tiny stores.
        part = vals.reshape(block_m // 8, 8, LANES).sum(axis=0)
        o_ref[...] += part.reshape(1, 8, LANES)

    ragged = (rows % block_m) != 0
    full_blocks = total_blocks - 1 if ragged else total_blocks
    has_dummy = grid_blocks > total_blocks          # clamped extra blocks

    if ragged or has_dummy:
        @pl.when(b < full_blocks)
        def _full():
            accumulate(focal)
    else:
        accumulate(focal)                            # common fast path: no guard

    if ragged:
        # Only the single tail block contains Pallas edge-padding garbage rows;
        # mask them here (row-index mask only: no *128 multiply, no overflow).
        @pl.when(b == total_blocks - 1)
        def _tail():
            valid_rows = rows - (total_blocks - 1) * block_m
            rid = jax.lax.broadcasted_iota(jnp.int32, (block_m, LANES), 0)
            accumulate(jnp.where(rid < valid_rows, focal, 0.0))


def focal_loss(logits, targets, *, alpha=ALPHA, gamma=GAMMA,
               hard_targets=False):
    assert logits.shape == targets.shape
    n_total = math.prod(logits.shape) if logits.shape else 1

    x = logits.reshape(-1)            # reshape of contiguous array: bitcast
    t = targets.reshape(-1)

    rows = n_total // LANES
    rem = n_total - rows * LANES

    if rows < 8:
        # Too small for (8,128)-tiled kernel to pay off; XLA fuses this.
        return jnp.sum(_focal_elementwise(x, t, alpha, gamma)) / n_total

    tail_sum = 0.0
    if rem:
        # <128 trailing elements: plain jnp (tiny).  NOTE: the prefix slice
        # below does force one XLA copy for non-128-multiple sizes; that is
        # unavoidable without 1-D layouts / manual DMA.  128-aligned inputs
        # take the zero-copy bitcast-reshape path and never hit this branch.
        tail_sum = jnp.sum(_focal_elementwise(
            x[rows * LANES:], t[rows * LANES:], alpha, gamma))
        x = x[:rows * LANES]
        t = t[:rows * LANES]

    x2d = x.reshape(rows, LANES)      # bitcast, no copy, for aligned inputs
    t2d = t.reshape(rows, LANES)

    block_m = min(MAX_BLOCK_M, (rows // 8) * 8)      # multiple of 8, <= rows
    total_blocks = pl.cdiv(rows, block_m)
    ncores = _num_tensorcores() if total_blocks >= 2 else 1
    ncores = min(ncores, total_blocks)
    blocks_per_core = pl.cdiv(total_blocks, ncores)
    grid_blocks = ncores * blocks_per_core

    if grid_blocks > total_blocks:
        # At most one dummy trailing block on the last core: clamp its read to
        # a valid block (cheap DMA); the kernel skips its contribution.
        def in_index_map(c, i):
            return (jnp.minimum(c * blocks_per_core + i, total_blocks - 1), 0)
    else:
        def in_index_map(c, i):
            return (c * blocks_per_core + i, 0)

    kernel = functools.partial(
        _focal_loss_kernel,
        alpha=float(alpha), gamma=float(gamma), hard_targets=bool(hard_targets),
        rows=rows, block_m=block_m, blocks_per_core=blocks_per_core,
        total_blocks=total_blocks, grid_blocks=grid_blocks,
    )

    out = pl.pallas_call(
        kernel,
        out_shape=jax.ShapeDtypeStruct((ncores, 8, LANES), jnp.float32),
        grid_spec=pltpu.PrefetchScalarGridSpec(
            num_scalar_prefetch=0,
            grid=(ncores, blocks_per_core),
            in_specs=[
                pl.BlockSpec((block_m, LANES), in_index_map),
                pl.BlockSpec((block_m, LANES), in_index_map),
            ],
            out_specs=pl.BlockSpec((1, 8, LANES), lambda c, i: (c, 0, 0)),
        ),
        compiler_params=pltpu.CompilerParams(
            dimension_semantics=("parallel", "arbitrary"),
            vmem_limit_bytes=VMEM_LIMIT_BYTES,
        ),
    )(x2d, t2d)

    # Tiny final cross-lane/core reduce + mean normalization in the wrapper.
    return (jnp.sum(out) + tail_sum) / n_total


def _focal_loss_ref(logits, targets, alpha=ALPHA, gamma=GAMMA):
    return jnp.mean(_focal_elementwise(logits, targets, alpha, gamma))


if __name__ == "__main__":
    key = jax.random.PRNGKey(0)
    k1, k2 = jax.random.split(key)

    # Detection-style logits/targets in NCHW: (B=2, C=4, H=16, W=16)
    logits = jax.random.normal(k1, (2, 4, 16, 16), dtype=jnp.float32)
    targets = (jax.random.uniform(k2, (2, 4, 16, 16)) > 0.7).astype(jnp.float32)

    loss = focal_loss(logits, targets)
    jax.block_until_ready(loss)
    ref = _focal_loss_ref(logits, targets)
    assert jnp.allclose(loss, ref, rtol=1e-5, atol=1e-6), (loss, ref)

    # Ragged path: element count not a multiple of 128 (exercises the masked
    # tail block in-kernel + the <128-element jnp remainder).
    k3, k4 = jax.random.split(k1)
    logits2 = jax.random.normal(k3, (3, 5, 7, 11), dtype=jnp.float32)
    targets2 = (jax.random.uniform(k4, (3, 5, 7, 11)) > 0.5).astype(jnp.float32)
    loss2 = focal_loss(logits2, targets2)
    jax.block_until_ready(loss2)
    ref2 = _focal_loss_ref(logits2, targets2)
    assert jnp.allclose(loss2, ref2, rtol=1e-5, atol=1e-6), (loss2, ref2)

    # Optional hard-target fast path (select + approx reciprocal instead of a
    # second exp); looser tolerance because of the approximate reciprocal.
    loss3 = focal_loss(logits, targets, hard_targets=True)
    jax.block_until_ready(loss3)
    assert jnp.allclose(loss3, ref, rtol=1e-2, atol=1e-3), (loss3, ref)

    print("KERNEL_OK")
</pallas_src>

<mosaic_0001>
module attributes {stable_mosaic.version = 11 : i64} {
  func.func @_focal_loss_kernel(%arg0: i32, %arg1: i32, %arg2: memref<16x128xf32, #tpu.memory_space<vmem>>, %arg3: memref<16x128xf32, #tpu.memory_space<vmem>>, %arg4: memref<1x8x128xf32, #tpu.memory_space<vmem>>) attributes {dimension_semantics = [#tpu.dimension_semantics<parallel>, #tpu.dimension_semantics<arbitrary>], iteration_bounds = array<i64: 1, 1>, scalar_prefetch = 0 : i64, scratch_operands = 0 : i64, tpu.core_type = #tpu.core_type<tc>, window_params = [{transform_indices = @transform_0, window_bounds = array<i64: 16, 128>}, {transform_indices = @transform_1, window_bounds = array<i64: 16, 128>}, {transform_indices = @transform_2, window_bounds = array<i64: 1, 8, 128>}]} {
    %c0_i32 = arith.constant 0 : i32
    %0 = arith.cmpi eq, %arg1, %c0_i32 : i32
    %1 = arith.extui %0 : i1 to i32
    %c0_i32_0 = arith.constant 0 : i32
    %2 = arith.cmpi ne, %1, %c0_i32_0 : i32
    scf.if %2 {
      %cst_14 = arith.constant 0.000000e+00 : f32
      %28 = vector.broadcast %cst_14 : f32 to vector<1x8x128xf32>
      %c0_15 = arith.constant 0 : index
      %c0_16 = arith.constant 0 : index
      %c0_17 = arith.constant 0 : index
      %29 = vector.load %arg4[%c0_15, %c0_16, %c0_17] : memref<1x8x128xf32, #tpu.memory_space<vmem>>, vector<1x8x128xf32>
      tpu.vector_store %arg4[%c0_15, %c0_16, %c0_17], %28 {strides = array<i32>} : memref<1x8x128xf32, #tpu.memory_space<vmem>>, vector<1x8x128xf32>,
    } else {
    }
    %c0 = arith.constant 0 : index
    %c0_1 = arith.constant 0 : index
    %3 = vector.load %arg2[%c0, %c0_1] : memref<16x128xf32, #tpu.memory_space<vmem>>, vector<16x128xf32>
    %c0_2 = arith.constant 0 : index
    %c0_3 = arith.constant 0 : index
    %4 = vector.load %arg3[%c0_2, %c0_3] : memref<16x128xf32, #tpu.memory_space<vmem>>, vector<16x128xf32>
    %5 = math.absf %3 : vector<16x128xf32>
    %cst = arith.constant 0.000000e+00 : f32
    %6 = vector.broadcast %cst : f32 to vector<16x128xf32>
    %7 = arith.subf %6, %5 : vector<16x128xf32>
    %8 = math.exp %7 : vector<16x128xf32>
    %cst_4 = arith.constant 0.000000e+00 : f32
    %9 = vector.broadcast %cst_4 : f32 to vector<16x128xf32>
    %10 = arith.maximumf %3, %9 : vector<16x128xf32>
    %11 = arith.mulf %3, %4 : vector<16x128xf32>
    %12 = arith.subf %10, %11 : vector<16x128xf32>
    %13 = math.log1p %8 : vector<16x128xf32>
    %14 = arith.addf %12, %13 : vector<16x128xf32>
    %cst_5 = arith.constant 0.000000e+00 : f32
    %15 = vector.broadcast %cst_5 : f32 to vector<16x128xf32>
    %16 = arith.subf %15, %14 : vector<16x128xf32>
    %17 = math.exp %16 : vector<16x128xf32>
    %cst_6 = arith.constant 1.000000e+00 : f32
    %18 = vector.broadcast %cst_6 : f32 to vector<16x128xf32>
    %19 = arith.subf %18, %17 : vector<16x128xf32>
    %20 = arith.mulf %19, %19 : vector<16x128xf32>
    %21 = arith.mulf %20, %14 : vector<16x128xf32>
    %22 = vector.shape_cast %21 : vector<16x128xf32> to vector<2x8x128xf32>
    %cst_7 = arith.constant dense<0.000000e+00> : vector<8x128xf32>
    %23 = vector.multi_reduction <add>, %22, %cst_7 [0] : vector<2x8x128xf32> to vector<8x128xf32>
    %c0_8 = arith.constant 0 : index
    %c0_9 = arith.constant 0 : index
    %c0_10 = arith.constant 0 : index
    %24 = vector.load %arg4[%c0_8, %c0_9, %c0_10] : memref<1x8x128xf32, #tpu.memory_space<vmem>>, vector<1x8x128xf32>
    %25 = vector.shape_cast %23 : vector<8x128xf32> to vector<1x8x128xf32>
    %26 = arith.addf %24, %25 : vector<1x8x128xf32>
    %c0_11 = arith.constant 0 : index
    %c0_12 = arith.constant 0 : index
    %c0_13 = arith.constant 0 : index
    %27 = vector.load %arg4[%c0_11, %c0_12, %c0_13] : memref<1x8x128xf32, #tpu.memory_space<vmem>>, vector<1x8x128xf32>
    tpu.vector_store %arg4[%c0_11, %c0_12, %c0_13], %26 {strides = array<i32>} : memref<1x8x128xf32, #tpu.memory_space<vmem>>, vector<1x8x128xf32>,
    return
  }
  func.func @transform_0(%arg0: i32, %arg1: i32) -> (i32, i32) {
    %c1_i32 = arith.constant 1 : i32
    %0 = arith.muli %arg0, %c1_i32 : i32
    %1 = arith.addi %0, %arg1 : i32
    %c0_i32 = arith.constant 0 : i32
    %c0_i32_0 = arith.constant 0 : i32
    return %1, %c0_i32 : i32, i32
  }
  func.func @transform_1(%arg0: i32, %arg1: i32) -> (i32, i32) {
    %c1_i32 = arith.constant 1 : i32
    %0 = arith.muli %arg0, %c1_i32 : i32
    %1 = arith.addi %0, %arg1 : i32
    %c0_i32 = arith.constant 0 : i32
    %c0_i32_0 = arith.constant 0 : i32
    return %1, %c0_i32 : i32, i32
  }
  func.func @transform_2(%arg0: i32, %arg1: i32) -> (i32, i32, i32) {
    %c0_i32 = arith.constant 0 : i32
    %c0_i32_0 = arith.constant 0 : i32
    %c0_i32_1 = arith.constant 0 : i32
    return %arg0, %c0_i32, %c0_i32_0 : i32, i32, i32
  }
}

</mosaic_0001>

<bundles_post_ra>
// kernel: tpu_custom_call.1
= control target key start
LH: loop header
LB: loop body
LE: loop exit
PB: predicated region body
PF: predicated region fallthrough
CT: control target
= control target key end

     0   :  { %7 = vsyncpa [#allocation3], 0  ;;  %s240_s0 = inlined_call_operand.hbm [shape: f32[16,128], index: 0, kind: input, shape index: {}]   ;;  %s241_s1 = inlined_call_operand.hbm [shape: f32[16,128], index: 1, kind: input, shape index: {}]   ;;  %s242_s2 = inlined_call_operand.hbm [shape: f32[1,8,128], index: 2, kind: output, shape index: {}]  }
   0x1   :  { %8 = vsyncpa [#allocation6], 0 }
   0x2   :  { %9 = vsyncpa [#allocation4], 0  ;;  %s211_s9 = smov [#allocation2]  }
   0x3   :  { %s19_s10 = sshll.u32 %s211_s9, 4  ;;  %s20_s10 = int_to_ptr.vmem [resolvable:$true] %s19_s10 }
   0x4   :  { %s153_s11 = scalar_lea.vmem %s20_s10, 256  ;;  %p158_p1 = scmp.lt.s32.totalorder %s20_s10, %s20_s10 }
   0x5   :  { %p154_p0 = scmp.ne.s32.totalorder %s20_s10, %s153_s11  ;;  %p159_p2 = scmp.lt.s32.totalorder %s153_s11, %s153_s11 }
   0x7   :  { %p160_p3 = por %p159_p2, %p158_p1 }
   0x9   :  { %p161_p4 = pnand %p160_p3, %p154_p0 }
   0xb   :  { %164 = shalt.err (!%p161_p4)
}
   0xc   :  { %s212_s12 = smov 128   ;;  %s213_s13 = smov 8  }
   0xd   :  { %25 = dma.hbm_to_vmem [thread:$0]  %s240_s0, 256, %s20_s10, [#allocation3], %s212_s12, %s212_s12, %s213_s13  }
   0xe   :  { %s214_s16 = smov [#allocation5]  }
   0xf   :  { %s35_s17 = sshll.u32 %s214_s16, 4  ;;  %s36_s17 = int_to_ptr.vmem [resolvable:$true] %s35_s17 }
  0x10   :  { %s173_s18 = scalar_lea.vmem %s36_s17, 256  ;;  %p178_p6 = scmp.lt.s32.totalorder %s36_s17, %s36_s17 }
  0x11   :  { %p174_p5 = scmp.ne.s32.totalorder %s36_s17, %s173_s18  ;;  %p179_p7 = scmp.lt.s32.totalorder %s173_s18, %s173_s18 }
  0x13   :  { %p180_p8 = por %p179_p7, %p178_p6 }
  0x15   :  { %p181_p9 = pnand %p180_p8, %p174_p5 }
  0x17   :  { %184 = shalt.err (!%p181_p9)
}
  0x18   :  { %41 = dma.hbm_to_vmem [thread:$0]  %s241_s1, 256, %s36_s17, [#allocation6], %s212_s12, %s212_s12, %s213_s13  }
  0x19   :  { %205 = dma.done.wait [#allocation3], 256  }
  0x1a   :  { %206 = vsyncadd [#allocation3], 4294967040 }
  0x1b   :  { %207 = dma.done.wait [#allocation6], 256  }
  0x1c   :  { %208 = vsyncadd [#allocation6], 4294967040  ;;  %v57_v0 = vld [vmem:[#allocation2] sm:$0xff]  ;;  %v58_v1 = vld [vmem:[#allocation2 + $0x8] sm:$0xff]  ;;  %s215_s0 = smov [#allocation7]  }
  0x1d   :  { %v61_v2 = vand.u32 2147483647, %v57_v0  ;;  %v62_v3 = vand.u32 2147483647, %v58_v1  ;;  %v59_v14 = vld [vmem:[#allocation5] sm:$0xff]  ;;  %v60_v15 = vld [vmem:[#allocation5 + $0x8] sm:$0xff] }
  0x1e   :  { %v69_v17 = vmax.f32 %v57_v0, 0.0  ;;  %v71_v18 = vmul.f32 %v59_v14, %v57_v0  ;;  %v70_v21 = vmax.f32 %v58_v1, 0.0  ;;  %v72_v22 = vmul.f32 %v60_v15, %v58_v1  ;;  %s117_s1 = sshll.u32 %s215_s0, 4  ;;  %s118_s1 = int_to_ptr.vmem [resolvable:$true] %s117_s1 }
  0x1f   :  { %v63_v4 = vsub.f32 0.0, %v61_v2  ;;  %v64_v5 = vsub.f32 0.0, %v62_v3  ;;  %s185_s21 = scalar_lea.vmem %s118_s1, 128  ;;  %p190_p11 = scmp.lt.s32.totalorder %s118_s1, %s118_s1 }
  0x20   :  { %v73_v26 = vsub.f32 %v69_v17, %v71_v18  ;;  %v74_v29 = vsub.f32 %v70_v21, %v72_v22  ;;  %p186_p10 = scmp.ne.s32.totalorder %s118_s1, %s185_s21  ;;  %p191_p12 = scmp.lt.s32.totalorder %s185_s21, %s185_s21 }
  0x21   :  { %v65_v6 = vmul.f32 1.442695, %v63_v4  ;;  %v67_v7 = vmul.f32 1.442695, %v64_v5 }
  0x22   :  { %p192_p13 = por %p191_p12, %p190_p11 }
  0x23   :  { %133 = vpow2.f32 %v65_v6 }
  0x24   :  { %135 = vpow2.f32 %v67_v7  ;;  %p193_p0 = pnand %p192_p13, %p186_p10 }
  0x30   :  { %v134_v8 = vpop.eup %133 }
  0x31   :  { %v136_v9 = vpop.eup %135  ;;  %v75_v10 = vadd.f32 1.0, %v134_v8  ;;  %v78_v12 = vmul.f32 -0.5, %v134_v8  ;;  %v81_v19 = vand.u32 2147483647, %v134_v8 }
  0x32   :  { %v84_v11 = vadd.f32 1.0, %v136_v9  ;;  %v87_v13 = vmul.f32 -0.5, %v136_v9  ;;  %v90_v23 = vand.u32 2147483647, %v136_v9 }
  0x33   :  { %137 = vlog2.f32 %v75_v10  ;;  %v79_v16 = vadd.f32 1.0, %v78_v12  ;;  %vm82_vm0 = vcmp.lt.f32.partialorder %v81_v19, 0.0004427343 }
  0x34   :  { %139 = vlog2.f32 %v84_v11  ;;  %v88_v20 = vadd.f32 1.0, %v87_v13  ;;  %vm91_vm1 = vcmp.lt.f32.partialorder %v90_v23, 0.0004427343 }
  0x35   :  { %v80_v24 = vmul.f32 %v134_v8, %v79_v16 }
  0x36   :  { %v89_v27 = vmul.f32 %v136_v9, %v88_v20 }
  0x40   :  { %v138_v25 = vpop.eup %137 }
  0x41   :  { %v140_v28 = vpop.eup %139  ;;  %v77_v30 = vmul.f32 0.6931472, %v138_v25 }
  0x42   :  { %v86_v31 = vmul.f32 0.6931472, %v140_v28 }
  0x43   :  { %v83_v32 = vsel %vm82_vm0, %v80_v24, %v77_v30 }
  0x44   :  { %v92_v33 = vsel %vm91_vm1, %v89_v27, %v86_v31  ;;  %v93_v34 = vadd.f32 %v83_v32, %v73_v26 }
  0x45   :  { %v94_v35 = vadd.f32 %v92_v33, %v74_v29 }
  0x46   :  { %v95_v36 = vsub.f32 0.0, %v93_v34 }
  0x47   :  { %v96_v37 = vsub.f32 0.0, %v94_v35 }
  0x48   :  { %v97_v38 = vmul.f32 1.442695, %v95_v36 }
  0x49   :  { %v99_v39 = vmul.f32 1.442695, %v96_v37 }
  0x4a   :  { %141 = vpow2.f32 %v97_v38 }
  0x4b   :  { %143 = vpow2.f32 %v99_v39 }
  0x57   :  { %v142_v40 = vpop.eup %141 }
  0x58   :  { %v144_v41 = vpop.eup %143  ;;  %v101_v42 = vsub.f32 1.0, %v142_v40 }
  0x59   :  { %v102_v43 = vsub.f32 1.0, %v144_v41 }
  0x5a   :  { %v103_v44 = vmul.f32 %v101_v42, %v101_v42 }
  0x5b   :  { %v104_v45 = vmul.f32 %v102_v43, %v102_v43 }
  0x5c   :  { %v105_v46 = vmul.f32 %v103_v44, %v93_v34 }
  0x5d   :  { %v106_v47 = vmul.f32 %v104_v45, %v94_v35 }
  0x5f   :  { %v107_v48 = vadd.f32 %v106_v47, %v105_v46 }
  0x61   :  { %110 = vst [vmem:[#allocation7] sm:$0xff] %v107_v48 }
  0x62   :  { %196 = shalt.err (!%p193_p0)
}
  0x63   :  { %120 = dma.vmem_to_hbm [thread:$0]  %s118_s1, 128, %s242_s2, [#allocation4]  }
  0x64   :  { %209 = dma.done.wait [#allocation4], 128  }
  0x65   :  { %210 = vsyncadd [#allocation4], 4294967168 }
  0x66   :  { %124 = vsyncpa [#allocation3], 1 }
  0x67   :  { %125 = vsyncpa [#allocation6], 1 }
  0x68   :  { %126 = vsyncpa [#allocation4], 1 }

</bundles_post_ra>
